<compile_context>
chip_gen: v6e
topology: v6e:2x2x1
jax: 0.10.0
libtpu: 0.0.40
codegen_flags: <defaults>
</compile_context>

<pallas_src>
import math

import jax
import jax.numpy as jnp
from jax.experimental import pallas as pl
from jax.experimental.pallas import tpu as pltpu


def _channel_embed_kernel(xt_ref, w_ref, b_ref, o_ref):
    """One (batch, T-tile) grid step.

    xt_ref: (1, C_in, TILE_T)   input slab, T on the lane axis
    w_ref : (C_out, C_in)       full weight, resident across the grid
    b_ref : (C_out, 1)          bias column
    o_ref : (1, C_out, TILE_T)  output slab, T on the lane axis (lane-dense stores)
    """
    c_in = xt_ref.shape[1]
    c_out, tile_t = o_ref.shape[1], o_ref.shape[2]

    xt = xt_ref[0].astype(jnp.float32)       # (C_in, TILE_T)
    w = w_ref[...].astype(jnp.float32)       # (C_out, C_in)
    b = b_ref[...].astype(jnp.float32)       # (C_out, 1)

    # Tiny contraction: unrolled VPU broadcast-FMA (skips the badly utilized
    # K=4, N=32 MXU path). f32 accumulation throughout.
    acc = jnp.broadcast_to(b, (c_out, tile_t))
    for c in range(c_in):                    # static unroll, C_in is small
        acc = acc + w[:, c:c + 1] * xt[c:c + 1, :]

    o_ref[0] = acc.astype(o_ref.dtype)


def channel_embedding(x, weight, bias, *, tile_t=2048):
    """x: (B, T, C_in); weight: (C_out, C_in) (conv weight squeezed); bias: (C_out,).

    Returns the PyTorch forward output: squeeze of (B, C_out, T).
    """
    B, T, C_in = x.shape
    C_out = weight.shape[0]

    # (B, T, C_in) -> (B, C_in, T): T becomes the lane axis, so both the input
    # loads and the (C_out, T) output stores are lane-dense, and the output
    # comes out of the kernel already in PyTorch layout (no wrapper transpose
    # of the much larger output array).
    x_t = jnp.transpose(x, (0, 2, 1))

    # Tile T: full extent when small, otherwise a lane-aligned tile (pad the
    # ragged tail with zeros and slice the result back).
    if T <= tile_t:
        tile = T
        t_pad = T
    else:
        tile = tile_t
        t_pad = pl.cdiv(T, tile) * tile
        if t_pad != T:
            x_t = jnp.pad(x_t, ((0, 0), (0, 0), (0, t_pad - T)))

    grid = (B, t_pad // tile)

    itemsize = jnp.dtype(x.dtype).itemsize
    cost = pl.CostEstimate(
        flops=2 * B * T * C_in * C_out,
        transcendentals=0,
        bytes_accessed=(B * T * C_in + C_out * C_in + C_out + B * C_out * T) * itemsize,
    )

    out = pl.pallas_call(
        _channel_embed_kernel,
        out_shape=jax.ShapeDtypeStruct((B, C_out, t_pad), x.dtype),
        grid=grid,
        in_specs=[
            pl.BlockSpec((1, C_in, tile), lambda b, i: (b, 0, i)),
            pl.BlockSpec((C_out, C_in), lambda b, i: (0, 0)),
            pl.BlockSpec((C_out, 1), lambda b, i: (0, 0)),
        ],
        out_specs=pl.BlockSpec((1, C_out, tile), lambda b, i: (b, 0, i)),
        compiler_params=pltpu.CompilerParams(
            dimension_semantics=("parallel", "parallel"),
        ),
        cost_estimate=cost,
    )(x_t, weight, bias.reshape(C_out, 1))

    if t_pad != T:
        out = out[:, :, :T]

    # Match the module's trailing `.squeeze()` (drops any size-1 dims, e.g. B=1).
    return jnp.squeeze(out)


if __name__ == "__main__":
    # Small shapes consistent with the module: batch=2, seq=8, in_channels=4, out_channels=32.
    B, T, C_in, C_out = 2, 8, 4, 32

    key = jax.random.PRNGKey(0)
    kx, kw, kb = jax.random.split(key, 3)

    x = jax.random.normal(kx, (B, T, C_in), dtype=jnp.float32)

    # Deterministic params matching nn.Conv2d(1, C_out, (1, C_in)) shapes:
    # weight (C_out, 1, 1, C_in) squeezed to (C_out, C_in); bias (C_out,).
    fan_in = 1 * 1 * C_in
    bound = 1.0 / math.sqrt(fan_in)
    weight = jax.random.uniform(kw, (C_out, C_in), minval=-bound, maxval=bound,
                                dtype=jnp.float32)
    bias = jax.random.uniform(kb, (C_out,), minval=-bound, maxval=bound,
                              dtype=jnp.float32)

    out = channel_embedding(x, weight, bias)
    out = jax.block_until_ready(out)

    ref = jnp.einsum("btc,oc->bot", x, weight) + bias[None, :, None]
    assert out.shape == (B, C_out, T), out.shape
    assert jnp.allclose(out, ref, atol=1e-5, rtol=1e-5)

    # Also exercise the tiled/padded path (grid over T with a ragged tail).
    T2 = 300
    x2 = jax.random.normal(kx, (B, T2, C_in), dtype=jnp.float32)
    out2 = jax.block_until_ready(channel_embedding(x2, weight, bias, tile_t=128))
    ref2 = jnp.einsum("btc,oc->bot", x2, weight) + bias[None, :, None]
    assert out2.shape == (B, C_out, T2), out2.shape
    assert jnp.allclose(out2, ref2, atol=1e-5, rtol=1e-5)

    print("KERNEL_OK")
</pallas_src>

<mosaic_0001>
module attributes {stable_mosaic.version = 11 : i64} {
  func.func @_channel_embed_kernel(%arg0: i32, %arg1: i32, %arg2: memref<1x4x8xf32, #tpu.memory_space<vmem>>, %arg3: memref<32x4xf32, #tpu.memory_space<vmem>>, %arg4: memref<32x1xf32, #tpu.memory_space<vmem>>, %arg5: memref<1x32x8xf32, #tpu.memory_space<vmem>>) attributes {dimension_semantics = [#tpu.dimension_semantics<parallel>, #tpu.dimension_semantics<parallel>], iteration_bounds = array<i64: 2, 1>, scalar_prefetch = 0 : i64, scratch_operands = 0 : i64, tpu.core_type = #tpu.core_type<tc>, window_params = [{transform_indices = @transform_0, window_bounds = array<i64: 1, 4, 8>}, {pipeline_mode = #tpu.pipeline_mode<synchronous>, transform_indices = @transform_1, window_bounds = array<i64: 32, 4>}, {pipeline_mode = #tpu.pipeline_mode<synchronous>, transform_indices = @transform_2, window_bounds = array<i64: 32, 1>}, {transform_indices = @transform_3, window_bounds = array<i64: 1, 32, 8>}]} {
    %c0 = arith.constant 0 : index
    %c0_0 = arith.constant 0 : index
    %c0_1 = arith.constant 0 : index
    %0 = vector.load %arg2[%c0, %c0_0, %c0_1] : memref<1x4x8xf32, #tpu.memory_space<vmem>>, vector<1x4x8xf32>
    %1 = vector.shape_cast %0 : vector<1x4x8xf32> to vector<4x8xf32>
    %c0_2 = arith.constant 0 : index
    %c0_3 = arith.constant 0 : index
    %2 = vector.load %arg3[%c0_2, %c0_3] : memref<32x4xf32, #tpu.memory_space<vmem>>, vector<32x4xf32>
    %c0_4 = arith.constant 0 : index
    %c0_5 = arith.constant 0 : index
    %3 = vector.load %arg4[%c0_4, %c0_5] : memref<32x1xf32, #tpu.memory_space<vmem>>, vector<32x1xf32>
    %4 = vector.shape_cast %3 : vector<32x1xf32> to vector<32x1xf32>
    %5 = vector.broadcast %4 : vector<32x1xf32> to vector<32x8xf32>
    %6 = vector.extract_strided_slice %2 {offsets = [0, 0], sizes = [32, 1], strides = [1, 1]} : vector<32x4xf32> to vector<32x1xf32>
    %7 = vector.extract_strided_slice %1 {offsets = [0, 0], sizes = [1, 8], strides = [1, 1]} : vector<4x8xf32> to vector<1x8xf32>
    %8 = vector.broadcast %6 : vector<32x1xf32> to vector<32x8xf32>
    %9 = vector.broadcast %7 : vector<1x8xf32> to vector<32x8xf32>
    %10 = arith.mulf %8, %9 : vector<32x8xf32>
    %11 = arith.addf %5, %10 : vector<32x8xf32>
    %12 = vector.extract_strided_slice %2 {offsets = [0, 1], sizes = [32, 1], strides = [1, 1]} : vector<32x4xf32> to vector<32x1xf32>
    %13 = vector.extract_strided_slice %1 {offsets = [1, 0], sizes = [1, 8], strides = [1, 1]} : vector<4x8xf32> to vector<1x8xf32>
    %14 = vector.broadcast %12 : vector<32x1xf32> to vector<32x8xf32>
    %15 = vector.broadcast %13 : vector<1x8xf32> to vector<32x8xf32>
    %16 = arith.mulf %14, %15 : vector<32x8xf32>
    %17 = arith.addf %11, %16 : vector<32x8xf32>
    %18 = vector.extract_strided_slice %2 {offsets = [0, 2], sizes = [32, 1], strides = [1, 1]} : vector<32x4xf32> to vector<32x1xf32>
    %19 = vector.extract_strided_slice %1 {offsets = [2, 0], sizes = [1, 8], strides = [1, 1]} : vector<4x8xf32> to vector<1x8xf32>
    %20 = vector.broadcast %18 : vector<32x1xf32> to vector<32x8xf32>
    %21 = vector.broadcast %19 : vector<1x8xf32> to vector<32x8xf32>
    %22 = arith.mulf %20, %21 : vector<32x8xf32>
    %23 = arith.addf %17, %22 : vector<32x8xf32>
    %24 = vector.extract_strided_slice %2 {offsets = [0, 3], sizes = [32, 1], strides = [1, 1]} : vector<32x4xf32> to vector<32x1xf32>
    %25 = vector.extract_strided_slice %1 {offsets = [3, 0], sizes = [1, 8], strides = [1, 1]} : vector<4x8xf32> to vector<1x8xf32>
    %26 = vector.broadcast %24 : vector<32x1xf32> to vector<32x8xf32>
    %27 = vector.broadcast %25 : vector<1x8xf32> to vector<32x8xf32>
    %28 = arith.mulf %26, %27 : vector<32x8xf32>
    %29 = arith.addf %23, %28 : vector<32x8xf32>
    %c0_6 = arith.constant 0 : index
    %c0_7 = arith.constant 0 : index
    %c0_8 = arith.constant 0 : index
    %30 = vector.load %arg5[%c0_6, %c0_7, %c0_8] : memref<1x32x8xf32, #tpu.memory_space<vmem>>, vector<1x32x8xf32>
    %31 = vector.shape_cast %30 : vector<1x32x8xf32> to vector<32x8xf32>
    %32 = vector.shape_cast %29 : vector<32x8xf32> to vector<1x32x8xf32>
    tpu.vector_store %arg5[%c0_6, %c0_7, %c0_8], %32 {strides = array<i32>} : memref<1x32x8xf32, #tpu.memory_space<vmem>>, vector<1x32x8xf32>,
    return
  }
  func.func @transform_0(%arg0: i32, %arg1: i32) -> (i32, i32, i32) {
    %c0_i32 = arith.constant 0 : i32
    %c0_i32_0 = arith.constant 0 : i32
    return %arg0, %c0_i32, %arg1 : i32, i32, i32
  }
  func.func @transform_1(%arg0: i32, %arg1: i32) -> (i32, i32) {
    %c0_i32 = arith.constant 0 : i32
    %c0_i32_0 = arith.constant 0 : i32
    %c0_i32_1 = arith.constant 0 : i32
    return %c0_i32, %c0_i32_0 : i32, i32
  }
  func.func @transform_2(%arg0: i32, %arg1: i32) -> (i32, i32) {
    %c0_i32 = arith.constant 0 : i32
    %c0_i32_0 = arith.constant 0 : i32
    %c0_i32_1 = arith.constant 0 : i32
    return %c0_i32, %c0_i32_0 : i32, i32
  }
  func.func @transform_3(%arg0: i32, %arg1: i32) -> (i32, i32, i32) {
    %c0_i32 = arith.constant 0 : i32
    %c0_i32_0 = arith.constant 0 : i32
    return %arg0, %c0_i32, %arg1 : i32, i32, i32
  }
}

</mosaic_0001>

<bundles_post_ra>
// kernel: tpu_custom_call.1
= control target key start
LH: loop header
LB: loop body
LE: loop exit
PB: predicated region body
PF: predicated region fallthrough
CT: control target
= control target key end

     0   :  { %s524_s12 = smov 0   ;;  %s526_s13 = smov 0   ;;  %s593_s0 = inlined_call_operand.vmem [shape: f32[2,4,8], index: 0, kind: input, shape index: {}]   ;;  %s594_s1 = inlined_call_operand.vmem [shape: f32[32,4], index: 1, kind: input, shape index: {}]   ;;  %s595_s2 = inlined_call_operand.vmem [shape: f32[32,1], index: 2, kind: input, shape index: {}]   ;;  %s596_s3 = inlined_call_operand.vmem [shape: f32[2,32,8], index: 3, kind: output, shape index: {}]  }
   0x1   :  { %s528_s14 = smov 0  }
   0x2 LB: > { %s25_s15 = sadd.s32 1, %s494_s13  ;;  %p433_p0 = scmp.ge.s32.totalorder %s498_s14, 1  ;;  %s498_s14 = sphi %s528_s14, %s13_s14   ;;  %s494_s13 = sphi %s526_s13, %s598_s13   ;;  %s490_s12 = sphi %s524_s12, %s597_s12  }
   0x3   : > { %p27_p1 = scmp.ge.s32.totalorder %s25_s15, 2  ;;  %p155_p2 = scmp.lt.s32.totalorder %s498_s14, 3 }
   0x5   : > { %s600_s15 = smov (%p27_p1, %s25_s15), 0  ;;  %p156_p3 = pnand %p433_p0, %p155_p2 }
   0x6   : > { %p184_p4 = scmp.lt.s32.totalorder (!%p156_p3), %s490_s12, 1 }
   0x7   : > { %159 = sbr.rel (%p156_p3) target bundleno = 186 (0xba), region = 32 }
   0xc   : > { %v204_v0 = vld [vmem:[%s595_s2] sm:$0xff]  ;;  %v500_v2 = vmov 0   ;;  %v205_v3 = vld [vmem:[%s595_s2 + $0x8] sm:$0xff]  ;;  %v202_v5 = vld [vmem:[%s594_s1 + $0x10] sm:$0xff]  ;;  %v501_v9 = vmov 1   ;;  %v502_v10 = vmov 2   ;;  %v248_v16 = vlaneseq }
   0xd   : > { %v200_v1 = vld [vmem:[%s594_s1] sm:$0xff]  ;;  %469 = vset.pattern.permute.xlu1 %v500_v2  ;;  %468 = vset.pattern.permute.xlu0 %v500_v2  ;;  %v201_v4 = vld [vmem:[%s594_s1 + $0x8] sm:$0xff]  ;;  %v203_v6 = vld [vmem:[%s594_s1 + $0x18] sm:$0xff]  ;;  %v503_v11 = vmov 3   ;;  %s602_s12 = smov (!%p184_p4, %s490_s12), 1  ;;  %vm344_vm0 = vcmask 64512  }
   0xe   : > { %210 = vperm.xlu0 %468, %v204_v0   ;;  %230 = vperm.xlu1 %469, %v200_v1   ;;  %v206_v7 = vld [vmem:[%s595_s2 + $0x10] sm:$0xff]  ;;  %v207_v8 = vld [vmem:[%s595_s2 + $0x18] sm:$0xff]  ;;  %s434_s5 = sshll.u32 %s602_s12, 2  ;;  %v249_v19 = vshrl.u32 %v248_v16, 7  ;;  %s439_s9 = sshll.u32 %s602_s12, 5 }
   0xf   : > { %s190_s8 = scalar_lea.vmem %s593_s0, %s434_s5  ;;  %s198_s16 = scalar_lea.vmem %s596_s3, %s439_s9 }
  0x10   : > { %v250_v22 = vsub.s32 0, %v249_v19  ;;  %v199_v23 = vld [vmem:[%s190_s8] sm:$0xf]  ;;  %v278_v26 = vsub.s32 1, %v249_v19  ;;  %v306_v28 = vsub.s32 2, %v249_v19  ;;  %v334_v34 = vsub.s32 3, %v249_v19 }
  0x12   : > { %215 = vperm.xlu0 %468, %v205_v3   ;;  %235 = vperm.xlu1 %469, %v201_v4   ;;  %v251_v27 = vrot.slane %v199_v23, %v250_v22  ;;  %v279_v31 = vrot.slane %v199_v23, %v278_v26  ;;  %v307_v33 = vrot.slane %v199_v23, %v306_v28 }
  0x13   : > { %v335_v40 = vrot.slane %v199_v23, %v334_v34 }
  0x16   : > { %240 = vperm.xlu0 %468, %v202_v5   ;;  %245 = vperm.xlu1 %469, %v203_v6  }
  0x1a   : > { %220 = vperm.xlu0 %468, %v206_v7   ;;  %225 = vperm.xlu1 %469, %v207_v8  }
  0x1e   : > { %470 = vset.pattern.permute.xlu0 %v501_v9  ;;  %471 = vset.pattern.permute.xlu1 %v501_v9 }
  0x1f   : > { %261 = vperm.xlu0 %470, %v200_v1   ;;  %265 = vperm.xlu1 %471, %v201_v4  }
  0x23   : > { %273 = vperm.xlu0 %470, %v203_v6   ;;  %269 = vperm.xlu1 %471, %v202_v5  }
  0x27   : > { %473 = vset.pattern.permute.xlu0 %v502_v10  ;;  %472 = vset.pattern.permute.xlu1 %v502_v10 }
  0x28   : > { %293 = vperm.xlu0 %473, %v201_v4   ;;  %289 = vperm.xlu1 %472, %v200_v1  }
  0x2c   : > { %474 = vset.pattern.permute.xlu0 %v503_v11  ;;  %297 = vperm.xlu1 %472, %v202_v5  }
  0x2d   : > { %317 = vperm.xlu0 %474, %v200_v1  }
  0x30   : > { %301 = vperm.xlu1 %472, %v203_v6  }
  0x31   : > { %329 = vperm.xlu0 %474, %v203_v6  }
  0x34   : > { %475 = vset.pattern.permute.xlu1 %v503_v11 }
  0x35   : > { %321 = vperm.xlu1 %475, %v201_v4  }
  0x39   : > { %325 = vperm.xlu1 %475, %v202_v5  }
  0x89   : > { %v211_v12 = vpop.permute.xlu0 %210  ;;  %v231_v13 = vpop.permute.xlu1 %230 }
  0x8a   : > { %v252_v32 = vmul.f32 %v251_v27, %v231_v13 }
  0x8c   : > { %v256_v38 = vadd.f32 %v252_v32, %v211_v12 }
  0x8d   : > { %v216_v14 = vpop.permute.xlu0 %215  ;;  %v236_v15 = vpop.permute.xlu1 %235 }
  0x8e   : > { %v253_v46 = vmul.f32 %v251_v27, %v236_v15 }
  0x90   : > { %v257_v56 = vadd.f32 %v253_v46, %v216_v14 }
  0x91   : > { %v241_v17 = vpop.permute.xlu0 %240  ;;  %v246_v18 = vpop.permute.xlu1 %245 }
  0x92   : > { %v255_v43 = vmul.f32 %v251_v27, %v246_v18  ;;  %v254_v60 = vmul.f32 %v251_v27, %v241_v17 }
  0x95   : > { %v221_v20 = vpop.permute.xlu0 %220  ;;  %v226_v21 = vpop.permute.xlu1 %225 }
  0x96   : > { %v259_v49 = vadd.f32 %v255_v43, %v226_v21  ;;  %v258_v1 = vadd.f32 %v254_v60, %v221_v20 }
  0x9a   : > { %v262_v24 = vpop.permute.xlu0 %261  ;;  %v266_v25 = vpop.permute.xlu1 %265 }
  0x9b   : > { %v280_v35 = vmul.f32 %v279_v31, %v262_v24  ;;  %v281_v50 = vmul.f32 %v279_v31, %v266_v25 }
  0x9d   : > { %v284_v41 = vadd.f32 %v280_v35, %v256_v38  ;;  %v285_v61 = vadd.f32 %v281_v50, %v257_v56 }
  0x9e   : > { %v274_v29 = vpop.permute.xlu0 %273  ;;  %v270_v30 = vpop.permute.xlu1 %269 }
  0x9f   : > { %v283_v44 = vmul.f32 %v279_v31, %v274_v29  ;;  %v282_v62 = vmul.f32 %v279_v31, %v270_v30 }
  0xa1   : > { %v287_v53 = vadd.f32 %v283_v44, %v259_v49  ;;  %v286_v5 = vadd.f32 %v282_v62, %v258_v1 }
  0xa3   : > { %v294_v36 = vpop.permute.xlu0 %293  ;;  %v290_v37 = vpop.permute.xlu1 %289 }
  0xa4   : > { %v308_v39 = vmul.f32 %v307_v33, %v290_v37  ;;  %v309_v57 = vmul.f32 %v307_v33, %v294_v36 }
  0xa6   : > { %v312_v47 = vadd.f32 %v308_v39, %v284_v41  ;;  %v313_v2 = vadd.f32 %v309_v57, %v285_v61 }
  0xa7   : > { %v298_v42 = vpop.permute.xlu1 %297 }
  0xa8   : > { %v318_v45 = vpop.permute.xlu0 %317  ;;  %v310_v3 = vmul.f32 %v307_v33, %v298_v42 }
  0xa9   : > { %v336_v48 = vmul.f32 %v335_v40, %v318_v45 }
  0xaa   : > { %v314_v8 = vadd.f32 %v310_v3, %v286_v5 }
  0xab   : > { %v340_v51 = vadd.f32 %v336_v48, %v312_v47  ;;  %v302_v52 = vpop.permute.xlu1 %301 }
  0xac   : > { %v311_v54 = vmul.f32 %v307_v33, %v302_v52  ;;  %v330_v55 = vpop.permute.xlu0 %329 }
  0xad   : > { %345 = vst.msk [vmem:[%s198_s16] sm:$0xff] %vm344_vm0, %v340_v51  ;;  %v339_v58 = vmul.f32 %v335_v40, %v330_v55 }
  0xae   : > { %v315_v59 = vadd.f32 %v311_v54, %v287_v53 }
  0xb0   : > { %v343_v63 = vadd.f32 %v339_v58, %v315_v59  ;;  %v322_v0 = vpop.permute.xlu1 %321 }
  0xb1   : > { %v337_v4 = vmul.f32 %v335_v40, %v322_v0 }
  0xb2   : > { %348 = vst.msk [vmem:[%s198_s16 + $0x18] sm:$0xff] %vm344_vm0, %v343_v63 }
  0xb3   : > { %v341_v6 = vadd.f32 %v337_v4, %v313_v2 }
  0xb4   : > { %v326_v7 = vpop.permute.xlu1 %325 }
  0xb5   : > { %346 = vst.msk [vmem:[%s198_s16 + $0x8] sm:$0xff] %vm344_vm0, %v341_v6  ;;  %v338_v9 = vmul.f32 %v335_v40, %v326_v7 }
  0xb7   : > { %v342_v10 = vadd.f32 %v338_v9, %v314_v8 }
  0xb9   : > { %347 = vst.msk [vmem:[%s198_s16 + $0x10] sm:$0xff] %vm344_vm0, %v342_v10 }
  0xba PF: > { %s13_s14 = sadd.s32 1, %s498_s14   ;;  %s597_s12 = smov %s494_s13 }
  0xbb   : > { %p10_p5 = scmp.ge.s32.totalorder %s13_s14, 4   ;;  %s598_s13 = smov %s600_s15 }
  0xbd   :  { %12 = sbr.rel (!%p10_p5) target bundleno = 2 (0x2), region = 62 }

</bundles_post_ra>
